<compile_context>
chip_gen: v7x
topology: tpu7x:2x2x1
jax: 0.10.0
libtpu: 0.0.40
codegen_flags: <defaults>
</compile_context>

<pallas_src>
import jax
import jax.numpy as jnp
from jax.experimental import pallas as pl
from jax.experimental.pallas import tpu as pltpu


def _scheduler_base_kernel(step_ref, lr_buf_ref, group_lr_in_ref, group_lr_out_ref):
    # compute_learning_rate(step): abstract / no-op in SchedulerBase.
    # TODO(synk): subclasses compute a step-dependent lr here on the scalar
    #             unit (warmup/cosine/exp decay) before the broadcast below.
    del group_lr_in_ref      # previous group lrs are unconditionally overwritten
    _ = step_ref[0]          # read to mirror the signature; unused by base class

    # update_learning_rate(): write the scalar buffer into every group slot.
    lr = lr_buf_ref[0]
    for g in range(group_lr_out_ref.shape[0]):   # tiny static N -> unrolled scalar stores
        group_lr_out_ref[g] = lr


def scheduler_base_forward(step, learning_rate_buffer, group_lrs):
    """Returns the updated (N,) per-group learning rates (state aliased in place)."""
    step_arr = jnp.asarray(step, dtype=jnp.int32).reshape((1,))
    lr_buf = jnp.asarray(learning_rate_buffer, dtype=jnp.float32).reshape((1,))
    group_lrs = jnp.asarray(group_lrs, dtype=jnp.float32)
    n = group_lrs.shape[0]

    return pl.pallas_call(
        _scheduler_base_kernel,
        out_shape=jax.ShapeDtypeStruct((n,), jnp.float32),
        in_specs=[
            pl.BlockSpec(memory_space=pltpu.SMEM),  # step (int32 scalar)
            pl.BlockSpec(memory_space=pltpu.SMEM),  # learning_rate buffer (f32 scalar)
            pl.BlockSpec(memory_space=pltpu.SMEM),  # existing per-group lrs (aliased)
        ],
        out_specs=pl.BlockSpec(memory_space=pltpu.SMEM),
        input_output_aliases={2: 0},                # update scheduler state in place
    )(step_arr, lr_buf, group_lrs)


if __name__ == "__main__":
    key = jax.random.PRNGKey(0)

    # Registered buffer from the PyTorch module: torch.ones(1).
    learning_rate_buffer = jnp.ones((1,), dtype=jnp.float32)

    # Synthetic optimizer with 4 param groups; their current lrs are scheduler
    # state that the forward pass overwrites with the buffer value.
    num_param_groups = 4
    group_lrs = jax.random.uniform(key, (num_param_groups,), dtype=jnp.float32)

    step = 7  # arbitrary; unused by the base class's no-op compute_learning_rate

    new_group_lrs = scheduler_base_forward(step, learning_rate_buffer, group_lrs)
    new_group_lrs = jax.block_until_ready(new_group_lrs)

    expected = jnp.ones((num_param_groups,), dtype=jnp.float32)
    assert new_group_lrs.shape == (num_param_groups,)
    assert new_group_lrs.dtype == jnp.float32
    assert bool(jnp.allclose(new_group_lrs, expected)), new_group_lrs

    print("KERNEL_OK")
</pallas_src>

<mosaic_0001>
module attributes {stable_mosaic.version = 11 : i64} {
  func.func @_scheduler_base_kernel(%arg0: memref<1xi32, #tpu.memory_space<smem>>, %arg1: memref<1xf32, #tpu.memory_space<smem>>, %arg2: memref<4xf32, #tpu.memory_space<smem>>, %arg3: memref<4xf32, #tpu.memory_space<smem>>) attributes {dimension_semantics = [], scalar_prefetch = 0 : i64, scratch_operands = 0 : i64, tpu.core_type = #tpu.core_type<tc>} {
    %c0 = arith.constant 0 : index
    %0 = memref.load %arg1[%c0] : memref<1xf32, #tpu.memory_space<smem>>
    %c0_0 = arith.constant 0 : index
    %1 = memref.load %arg3[%c0_0] : memref<4xf32, #tpu.memory_space<smem>>
    memref.store %0, %arg3[%c0_0] : memref<4xf32, #tpu.memory_space<smem>>
    %c1 = arith.constant 1 : index
    %2 = memref.load %arg3[%c1] : memref<4xf32, #tpu.memory_space<smem>>
    memref.store %0, %arg3[%c1] : memref<4xf32, #tpu.memory_space<smem>>
    %c2 = arith.constant 2 : index
    %3 = memref.load %arg3[%c2] : memref<4xf32, #tpu.memory_space<smem>>
    memref.store %0, %arg3[%c2] : memref<4xf32, #tpu.memory_space<smem>>
    %c3 = arith.constant 3 : index
    %4 = memref.load %arg3[%c3] : memref<4xf32, #tpu.memory_space<smem>>
    memref.store %0, %arg3[%c3] : memref<4xf32, #tpu.memory_space<smem>>
    return
  }
}

</mosaic_0001>

<bundles_post_ra>
// kernel: tpu_custom_call.1
= control target key start
LH: loop header
LB: loop body
LE: loop exit
PB: predicated region body
PF: predicated region fallthrough
CT: control target
= control target key end

     0   :  { %10 = vsyncpa [#allocation5], 0  ;;  %s135_s0 = inlined_call_operand.<no memory space> [shape: s32[1], index: 0, kind: input, shape index: {}]   ;;  %s136_s1 = inlined_call_operand.<no memory space> [shape: f32[1], index: 1, kind: input, shape index: {}]   ;;  %s137_s2 = inlined_call_operand.hbm [shape: f32[4], index: 2, kind: input, shape index: {}, may-alias: {2,3}]   ;;  %s138_s3 = inlined_call_operand.hbm [shape: f32[4], index: 3, kind: output, shape index: {}, may-alias: {2,3}]  }
   0x1   :  { %11 = vsyncpa [#allocation6], 0  ;;  %s53_s14 = scalar_lea.hbm %s137_s2, 16 }
   0x2   :  { %p54_p0 = scmp.ne.s32.totalorder %s137_s2, %s53_s14  ;;  %p57_p1 = scmp.lt.u32.totalorder %s53_s14, %s137_s2 }
   0x4   :  { %p59_p2 = pnand %p57_p1, %p54_p0 }
   0x6   :  { %62 = shalt.err (!%p59_p2)
}
   0x7   :  { %s77_s18 = smov [#allocation4]  }
   0x8   :  { %23 = dma.hbm_to_smem %s137_s2, 16, %s77_s18, [#allocation5]  }
   0x9   :  { %73 = dma.done.wait [#allocation5], 16  }
   0xa   :  { %74 = vsyncadd [#allocation5], 4294967280 }
   0xb   :  { %27 = sfence }
   0xc   :  { %30 = sst [smem:[#allocation7]] %s136_s1  ;;  %s63_s30 = scalar_lea.hbm %s138_s3, 16 }
   0xd   :  { %32 = sst [smem:[#allocation7 + $0x1]] %s136_s1  ;;  %p64_p3 = scmp.ne.s32.totalorder %s138_s3, %s63_s30 }
   0xe   :  { %34 = sst [smem:[#allocation7 + $0x2]] %s136_s1  ;;  %p67_p4 = scmp.lt.u32.totalorder %s63_s30, %s138_s3 }
   0xf   :  { %36 = sst [smem:[#allocation7 + $0x3]] %s136_s1 }
  0x10   :  { %p69_p5 = pnand %p67_p4, %p64_p3 }
  0x12   :  { %72 = shalt.err (!%p69_p5)
}
  0x13   :  { %s78_s8 = smov [#allocation7]  }
  0x14   :  { %44 = dma.smem_to_hbm %s78_s8, 16, %s138_s3, [#allocation6]  }
  0x15   :  { %75 = dma.done.wait [#allocation6], 16  }
  0x16   :  { %76 = vsyncadd [#allocation6], 4294967280 }
  0x17   :  { %48 = sfence }
  0x18   :  { %49 = vsyncpa [#allocation5], 1 }
  0x19   :  { %50 = vsyncpa [#allocation6], 1 }

</bundles_post_ra>
